<compile_context>
chip_gen: v6e
topology: v6e:2x2x1
jax: 0.10.0
libtpu: 0.0.40
codegen_flags: <defaults>
</compile_context>

<pallas_src>
import jax
import jax.numpy as jnp
from jax.experimental import pallas as pl
from jax.experimental.pallas import tpu as pltpu


def _round_up(x, m):
    return ((x + m - 1) // m) * m


def policy_kernel(x_ref, w1_ref, b1_ref, wdiff_ref, bdiff_ref, o_ref):
    # x_ref:     (TB, 4)    batch tile of states
    # w1_ref:    (4, 128)   fc[0] weights (resident across the grid)
    # b1_ref:    (1, 128)   fc[0] bias
    # wdiff_ref: (1, 128)   w2[:, 0] - w2[:, 1]  (lane-dense row)
    # bdiff_ref: (1, 1)     b2[0]   - b2[1]
    # o_ref:     (TB, 2)    action probabilities
    x = x_ref[...]

    # --- fc[0]: Linear(4, 128) + ReLU as VPU broadcast-FMAs (K=4 would use
    #     <4% of the MXU, so keep it on the vector units).
    h = (x[:, 0:1] * w1_ref[0:1, :]
         + x[:, 1:2] * w1_ref[1:2, :]
         + x[:, 2:3] * w1_ref[2:3, :]
         + x[:, 3:4] * w1_ref[3:4, :]
         + b1_ref[...])
    h = jnp.maximum(h, 0.0)                                   # (TB, 128)

    # --- fc[2] + softmax(dim=1) collapsed to a logit difference:
    #     d = h @ (w2[:,0]-w2[:,1]) + (b2[0]-b2[1])
    #     p0 = sigmoid(d), p1 = 1 - p0      (exactly softmax over 2 classes)
    d = jnp.sum(h * wdiff_ref[...], axis=1, keepdims=True) + bdiff_ref[...]

    # Numerically stable sigmoid (equivalent to max-subtracted softmax).
    neg_abs = -jnp.abs(d)
    e = jnp.exp(neg_abs)
    r = pl.reciprocal(1.0 + e, approx=False)   # exact to keep 1e-5 tolerance
    p_big = r                                   # prob of the larger logit
    p_small = e * r                             # prob of the smaller logit
    pos = d >= 0.0
    p0 = jnp.where(pos, p_big, p_small)
    p1 = jnp.where(pos, p_small, p_big)

    o_ref[:, 0:1] = p0
    o_ref[:, 1:2] = p1


def policy_forward(state, w1, b1, w2, b2, *, block_b=1024):
    """softmax(relu(state @ w1 + b1) @ w2 + b2, axis=1) via a Pallas kernel."""
    B = state.shape[0]
    state = state.astype(jnp.float32)

    # Fold the 2-wide output layer into a single lane-dense matvec.
    wdiff = (w2[:, 0] - w2[:, 1]).reshape(1, 128).astype(jnp.float32)
    bdiff = (b2[:, 0] - b2[:, 1]).reshape(1, 1).astype(jnp.float32)

    # Tile the batch; pad so every tile is full (keeps the (8,128) block rule
    # satisfied and avoids ragged masked tiles). TB ~ 1k keeps the (TB,128)
    # hidden activation at ~0.5 MiB, well inside scoped VMEM on v5e/v6e/v7x.
    tb = min(block_b, _round_up(B, 8))
    b_pad = _round_up(B, tb)
    if b_pad != B:
        state = jnp.pad(state, ((0, b_pad - B), (0, 0)))

    out = pl.pallas_call(
        policy_kernel,
        out_shape=jax.ShapeDtypeStruct((b_pad, 2), jnp.float32),
        grid=(b_pad // tb,),
        in_specs=[
            pl.BlockSpec((tb, 4), lambda i: (i, 0)),      # x: tiled over batch
            pl.BlockSpec((4, 128), lambda i: (0, 0)),     # w1: resident
            pl.BlockSpec((1, 128), lambda i: (0, 0)),     # b1: resident
            pl.BlockSpec((1, 128), lambda i: (0, 0)),     # wdiff: resident
            pl.BlockSpec((1, 1), lambda i: (0, 0)),       # bdiff: resident
        ],
        out_specs=pl.BlockSpec((tb, 2), lambda i: (i, 0)),
        compiler_params=pltpu.CompilerParams(
            dimension_semantics=("parallel",),            # megacore on v7x
        ),
    )(state, w1, b1, wdiff, bdiff)
    # TODO(synk): on v6e/v7x a bf16 HBM copy of `state` (upcast in-kernel)
    # would halve input HBM traffic; kept f32 to preserve exact fp semantics.
    return out[:B]


def init_params(key):
    """Deterministic init mirroring nn.Linear's uniform(-1/sqrt(fan_in)) scheme."""
    k1, k2, k3, k4 = jax.random.split(key, 4)
    in1, out1 = 4, 128
    in2, out2 = 128, 2
    bound1 = 1.0 / jnp.sqrt(in1)
    bound2 = 1.0 / jnp.sqrt(in2)
    w1 = jax.random.uniform(k1, (in1, out1), jnp.float32, -bound1, bound1)
    b1 = jax.random.uniform(k2, (1, out1), jnp.float32, -bound1, bound1)
    w2 = jax.random.uniform(k3, (in2, out2), jnp.float32, -bound2, bound2)
    b2 = jax.random.uniform(k4, (1, out2), jnp.float32, -bound2, bound2)
    return w1, b1, w2, b2


def _reference(state, w1, b1, w2, b2):
    h = jnp.maximum(state @ w1 + b1, 0.0)
    return jax.nn.softmax(h @ w2 + b2, axis=1)


if __name__ == "__main__":
    key = jax.random.PRNGKey(0)
    pkey, xkey, xkey2 = jax.random.split(key, 3)

    w1, b1, w2, b2 = init_params(pkey)

    # Small example consistent with the module: batch=2, features=4.
    state = jax.random.normal(xkey, (2, 4), jnp.float32)
    out = jax.block_until_ready(policy_forward(state, w1, b1, w2, b2))
    ref = _reference(state, w1, b1, w2, b2)
    assert out.shape == (2, 2)
    assert jnp.allclose(out, ref, atol=1e-5, rtol=1e-5)
    assert jnp.allclose(jnp.sum(out, axis=1), 1.0, atol=1e-5)

    # Exercise the multi-tile / ragged-batch path (B not a multiple of TB).
    state_big = jax.random.normal(xkey2, (2050, 4), jnp.float32)
    out_big = jax.block_until_ready(policy_forward(state_big, w1, b1, w2, b2))
    ref_big = _reference(state_big, w1, b1, w2, b2)
    assert out_big.shape == (2050, 2)
    assert jnp.allclose(out_big, ref_big, atol=1e-5, rtol=1e-5)
    assert jnp.allclose(jnp.sum(out_big, axis=1), 1.0, atol=1e-5)

    print("KERNEL_OK")
</pallas_src>

<mosaic_0001>
module attributes {stable_mosaic.version = 11 : i64} {
  func.func @policy_kernel(%arg0: i32, %arg1: memref<8x4xf32, #tpu.memory_space<vmem>>, %arg2: memref<4x128xf32, #tpu.memory_space<vmem>>, %arg3: memref<1x128xf32, #tpu.memory_space<vmem>>, %arg4: memref<1x128xf32, #tpu.memory_space<vmem>>, %arg5: memref<1x1xf32, #tpu.memory_space<vmem>>, %arg6: memref<8x2xf32, #tpu.memory_space<vmem>>) attributes {dimension_semantics = [#tpu.dimension_semantics<parallel>], iteration_bounds = array<i64: 1>, scalar_prefetch = 0 : i64, scratch_operands = 0 : i64, tpu.core_type = #tpu.core_type<tc>, window_params = [{transform_indices = @transform_0, window_bounds = array<i64: 8, 4>}, {pipeline_mode = #tpu.pipeline_mode<synchronous>, transform_indices = @transform_1, window_bounds = array<i64: 4, 128>}, {pipeline_mode = #tpu.pipeline_mode<synchronous>, transform_indices = @transform_2, window_bounds = array<i64: 1, 128>}, {pipeline_mode = #tpu.pipeline_mode<synchronous>, transform_indices = @transform_3, window_bounds = array<i64: 1, 128>}, {pipeline_mode = #tpu.pipeline_mode<synchronous>, transform_indices = @transform_4, window_bounds = array<i64: 1, 1>}, {transform_indices = @transform_5, window_bounds = array<i64: 8, 2>}]} {
    %c0 = arith.constant 0 : index
    %c0_0 = arith.constant 0 : index
    %0 = vector.load %arg1[%c0, %c0_0] : memref<8x4xf32, #tpu.memory_space<vmem>>, vector<8x4xf32>
    %1 = vector.extract_strided_slice %0 {offsets = [0, 0], sizes = [8, 1], strides = [1, 1]} : vector<8x4xf32> to vector<8x1xf32>
    %c0_1 = arith.constant 0 : index
    %c0_2 = arith.constant 0 : index
    %2 = vector.load %arg2[%c0_1, %c0_2] : memref<4x128xf32, #tpu.memory_space<vmem>>, vector<1x128xf32>
    %3 = vector.broadcast %1 : vector<8x1xf32> to vector<8x128xf32>
    %4 = vector.broadcast %2 : vector<1x128xf32> to vector<8x128xf32>
    %5 = arith.mulf %3, %4 : vector<8x128xf32>
    %6 = vector.extract_strided_slice %0 {offsets = [0, 1], sizes = [8, 1], strides = [1, 1]} : vector<8x4xf32> to vector<8x1xf32>
    %c1 = arith.constant 1 : index
    %c0_3 = arith.constant 0 : index
    %7 = vector.load %arg2[%c1, %c0_3] : memref<4x128xf32, #tpu.memory_space<vmem>>, vector<1x128xf32>
    %8 = vector.broadcast %6 : vector<8x1xf32> to vector<8x128xf32>
    %9 = vector.broadcast %7 : vector<1x128xf32> to vector<8x128xf32>
    %10 = arith.mulf %8, %9 : vector<8x128xf32>
    %11 = arith.addf %5, %10 : vector<8x128xf32>
    %12 = vector.extract_strided_slice %0 {offsets = [0, 2], sizes = [8, 1], strides = [1, 1]} : vector<8x4xf32> to vector<8x1xf32>
    %c2 = arith.constant 2 : index
    %c0_4 = arith.constant 0 : index
    %13 = vector.load %arg2[%c2, %c0_4] : memref<4x128xf32, #tpu.memory_space<vmem>>, vector<1x128xf32>
    %14 = vector.broadcast %12 : vector<8x1xf32> to vector<8x128xf32>
    %15 = vector.broadcast %13 : vector<1x128xf32> to vector<8x128xf32>
    %16 = arith.mulf %14, %15 : vector<8x128xf32>
    %17 = arith.addf %11, %16 : vector<8x128xf32>
    %18 = vector.extract_strided_slice %0 {offsets = [0, 3], sizes = [8, 1], strides = [1, 1]} : vector<8x4xf32> to vector<8x1xf32>
    %c3 = arith.constant 3 : index
    %c0_5 = arith.constant 0 : index
    %19 = vector.load %arg2[%c3, %c0_5] : memref<4x128xf32, #tpu.memory_space<vmem>>, vector<1x128xf32>
    %20 = vector.broadcast %18 : vector<8x1xf32> to vector<8x128xf32>
    %21 = vector.broadcast %19 : vector<1x128xf32> to vector<8x128xf32>
    %22 = arith.mulf %20, %21 : vector<8x128xf32>
    %23 = arith.addf %17, %22 : vector<8x128xf32>
    %c0_6 = arith.constant 0 : index
    %c0_7 = arith.constant 0 : index
    %24 = vector.load %arg3[%c0_6, %c0_7] : memref<1x128xf32, #tpu.memory_space<vmem>>, vector<1x128xf32>
    %25 = vector.broadcast %24 : vector<1x128xf32> to vector<8x128xf32>
    %26 = arith.addf %23, %25 : vector<8x128xf32>
    %cst = arith.constant 0.000000e+00 : f32
    %27 = vector.broadcast %cst : f32 to vector<8x128xf32>
    %28 = arith.maximumf %26, %27 : vector<8x128xf32>
    %c0_8 = arith.constant 0 : index
    %c0_9 = arith.constant 0 : index
    %29 = vector.load %arg4[%c0_8, %c0_9] : memref<1x128xf32, #tpu.memory_space<vmem>>, vector<1x128xf32>
    %30 = vector.broadcast %29 : vector<1x128xf32> to vector<8x128xf32>
    %31 = arith.mulf %28, %30 : vector<8x128xf32>
    %cst_10 = arith.constant dense<0.000000e+00> : vector<8xf32>
    %32 = vector.multi_reduction <add>, %31, %cst_10 [1] : vector<8x128xf32> to vector<8xf32>
    %33 = vector.shape_cast %32 : vector<8xf32> to vector<8x1xf32>
    %c0_11 = arith.constant 0 : index
    %c0_12 = arith.constant 0 : index
    %34 = vector.load %arg5[%c0_11, %c0_12] : memref<1x1xf32, #tpu.memory_space<vmem>>, vector<1x1xf32>
    %35 = vector.broadcast %34 : vector<1x1xf32> to vector<8x1xf32>
    %36 = arith.addf %33, %35 : vector<8x1xf32>
    %37 = math.absf %36 : vector<8x1xf32>
    %cst_13 = arith.constant 0.000000e+00 : f32
    %38 = vector.broadcast %cst_13 : f32 to vector<8x1xf32>
    %39 = arith.subf %38, %37 : vector<8x1xf32>
    %40 = math.exp %39 : vector<8x1xf32>
    %cst_14 = arith.constant 1.000000e+00 : f32
    %41 = vector.broadcast %cst_14 : f32 to vector<8x1xf32>
    %42 = arith.addf %41, %40 : vector<8x1xf32>
    %43 = tpu.reciprocal %42 : vector<8x1xf32> -> vector<8x1xf32>
    %44 = arith.mulf %40, %43 : vector<8x1xf32>
    %cst_15 = arith.constant 0.000000e+00 : f32
    %45 = vector.broadcast %cst_15 : f32 to vector<8x1xf32>
    %46 = arith.cmpf oge, %36, %45 : vector<8x1xf32>
    %47 = arith.select %46, %43, %44 : vector<8x1xi1>, vector<8x1xf32>
    %48 = arith.select %46, %44, %43 : vector<8x1xi1>, vector<8x1xf32>
    %c0_16 = arith.constant 0 : index
    %c0_17 = arith.constant 0 : index
    %49 = vector.load %arg6[%c0_16, %c0_17] : memref<8x2xf32, #tpu.memory_space<vmem>>, vector<8x1xf32>
    tpu.vector_store %arg6[%c0_16, %c0_17], %47 {strides = array<i32>} : memref<8x2xf32, #tpu.memory_space<vmem>>, vector<8x1xf32>,
    %c0_18 = arith.constant 0 : index
    %c1_19 = arith.constant 1 : index
    %50 = vector.load %arg6[%c0_18, %c1_19] : memref<8x2xf32, #tpu.memory_space<vmem>>, vector<8x1xf32>
    tpu.vector_store %arg6[%c0_18, %c1_19], %48 {strides = array<i32>} : memref<8x2xf32, #tpu.memory_space<vmem>>, vector<8x1xf32>,
    return
  }
  func.func @transform_0(%arg0: i32) -> (i32, i32) {
    %c0_i32 = arith.constant 0 : i32
    %c0_i32_0 = arith.constant 0 : i32
    return %arg0, %c0_i32 : i32, i32
  }
  func.func @transform_1(%arg0: i32) -> (i32, i32) {
    %c0_i32 = arith.constant 0 : i32
    %c0_i32_0 = arith.constant 0 : i32
    %c0_i32_1 = arith.constant 0 : i32
    return %c0_i32, %c0_i32_0 : i32, i32
  }
  func.func @transform_2(%arg0: i32) -> (i32, i32) {
    %c0_i32 = arith.constant 0 : i32
    %c0_i32_0 = arith.constant 0 : i32
    %c0_i32_1 = arith.constant 0 : i32
    return %c0_i32, %c0_i32_0 : i32, i32
  }
  func.func @transform_3(%arg0: i32) -> (i32, i32) {
    %c0_i32 = arith.constant 0 : i32
    %c0_i32_0 = arith.constant 0 : i32
    %c0_i32_1 = arith.constant 0 : i32
    return %c0_i32, %c0_i32_0 : i32, i32
  }
  func.func @transform_4(%arg0: i32) -> (i32, i32) {
    %c0_i32 = arith.constant 0 : i32
    %c0_i32_0 = arith.constant 0 : i32
    %c0_i32_1 = arith.constant 0 : i32
    return %c0_i32, %c0_i32_0 : i32, i32
  }
  func.func @transform_5(%arg0: i32) -> (i32, i32) {
    %c0_i32 = arith.constant 0 : i32
    %c0_i32_0 = arith.constant 0 : i32
    return %arg0, %c0_i32 : i32, i32
  }
}

</mosaic_0001>

<bundles_post_ra>
// kernel: tpu_custom_call.1
= control target key start
LH: loop header
LB: loop body
LE: loop exit
PB: predicated region body
PF: predicated region fallthrough
CT: control target
= control target key end

     0   :  { %v137_v0 = vmov 0   ;;  %v138_v2 = vmov 2   ;;  %v139_v3 = vmov 1   ;;  %v140_v4 = vmov 3   ;;  %s202_s0 = inlined_call_operand.vmem [shape: f32[8,4], index: 0, kind: input, shape index: {}]   ;;  %s203_s4 = inlined_call_operand.<no memory space> [shape: f32[1,1], index: 4, kind: input, shape index: {}]   ;;  %s204_s1 = inlined_call_operand.vmem [shape: f32[4,128], index: 1, kind: input, shape index: {}]   ;;  %s205_s2 = inlined_call_operand.vmem [shape: f32[1,128], index: 2, kind: input, shape index: {}]   ;;  %s206_s3 = inlined_call_operand.vmem [shape: f32[1,128], index: 3, kind: input, shape index: {}]   ;;  %s207_s5 = inlined_call_operand.vmem [shape: f32[8,2], index: 5, kind: output, shape index: {}]  }
   0x1   :  { %128 = vset.pattern.permute.xlu0 %v137_v0  ;;  %v22_v1 = vld [vmem:[%s202_s0] sm:$0xff]  ;;  %130 = vset.pattern.permute.xlu1 %v138_v2  ;;  %v10_v5 = vstv %s203_s4  ;;  %vm104_vm0 = vcmask 7168   ;;  %vm110_vm2 = vcmask 15368  }
   0x2   :  { %26 = vperm.xlu0 %128, %v22_v1   ;;  %47 = vperm.xlu1 %130, %v22_v1   ;;  %11 = vst [vmem:[#allocation2] sm:$0x1] %v10_v5  ;;  %v116_v8 = vld [vmem:[%s204_s1] ss:$0 sm:$0xff]  ;;  %v117_v9 = vld [vmem:[%s204_s1 + $0x1] ss:$0 sm:$0xff] }
   0x3   :  { %v118_v10 = vld [vmem:[%s204_s1 + $0x2] ss:$0 sm:$0xff]  ;;  %v119_v12 = vld [vmem:[%s204_s1 + $0x3] ss:$0 sm:$0xff]  ;;  %v120_v20 = vld [vmem:[%s205_s2] ss:$0 sm:$0xff] }
   0x4   :  { %v121_v23 = vld [vmem:[%s206_s3] ss:$0 sm:$0xff]  ;;  %s141_s3 = smov 1  }
   0x6   :  { %129 = vset.pattern.permute.xlu0 %v139_v3  ;;  %131 = vset.pattern.permute.xlu1 %v140_v4 }
   0x7   :  { %36 = vperm.xlu0 %129, %v22_v1   ;;  %58 = vperm.xlu1 %131, %v22_v1  }
   0x9   :  { %v122_v26 = vld [vmem:[#allocation2] ss:$0 sm:$0xff] }
   0xb   :  { %132 = vset.pattern.permute.xlu0 %v140_v4 }
  0x7d   :  { %v27_v6 = vpop.permute.xlu0 %26  ;;  %v48_v7 = vpop.permute.xlu1 %47 }
  0x7e   :  { %v33_v14 = vmul.f32 %v116_v8, %v27_v6  ;;  %v54_v16 = vmul.f32 %v118_v10, %v48_v7 }
  0x82   :  { %v37_v11 = vpop.permute.xlu0 %36  ;;  %v59_v13 = vpop.permute.xlu1 %58 }
  0x83   :  { %v43_v15 = vmul.f32 %v117_v9, %v37_v11  ;;  %v65_v18 = vmul.f32 %v119_v12, %v59_v13 }
  0x85   :  { %v44_v17 = vadd.f32 %v43_v15, %v33_v14 }
  0x87   :  { %v55_v19 = vadd.f32 %v54_v16, %v44_v17 }
  0x89   :  { %v66_v21 = vadd.f32 %v65_v18, %v55_v19 }
  0x8b   :  { %v74_v22 = vadd.f32 %v120_v20, %v66_v21 }
  0x8d   :  { %v75_v24 = vmax.f32 %v74_v22, 0.0 }
  0x8f   :  { %v83_v25 = vmul.f32 %v121_v23, %v75_v24 }
  0x91   :  { %84 = vadd.xlane.f32.xlu1 %v83_v25 }
 0x11a   :  { %v85_v27 = vpop.xlane.xlu1 %84 }
 0x11b   :  { %v93_v28 = vadd.f32 %v122_v26, %v85_v27 }
 0x11d   :  { %v94_v29 = vand.u32 2147483647, %v93_v28  ;;  %vm101_vm1 = vcmp.ge.f32.partialorder %v93_v28, 0.0 }
 0x11f   :  { %v95_v30 = vsub.f32 0.0, %v94_v29 }
 0x121   :  { %v96_v31 = vmul.f32 1.442695, %v95_v30 }
 0x123   :  { %133 = vpow2.f32 %v96_v31 }
 0x130   :  { %v134_v32 = vpop.eup %133 }
 0x131   :  { %v98_v33 = vadd.f32 1.0, %v134_v32 }
 0x133   :  { %135 = vrcp.f32 %v98_v33 }
 0x140   :  { %v136_v34 = vpop.eup %135 }
 0x141   :  { %v100_v35 = vmul.f32 %v136_v34, %v134_v32 }
 0x143   :  { %v102_v36 = vsel %vm101_vm1, %v136_v34, %v100_v35  ;;  %v103_v37 = vsel %vm101_vm1, %v100_v35, %v136_v34 }
 0x144   :  { %105 = vst.msk [vmem:[%s207_s5] sm:$0xff] %vm104_vm0, %v102_v36  ;;  %107 = vrot.lane.b32.xlu0 %v103_v37, %s141_s3 }
 0x1b6   :  { %v108_v38 = vpop.permute.xlu0 %107 }
 0x1b7   :  { %111 = vst.msk [vmem:[%s207_s5] sm:$0xff] %vm110_vm2, %v108_v38 }

</bundles_post_ra>
